<compile_context>
chip_gen: v7x
topology: tpu7x:2x2x1
jax: 0.10.0
libtpu: 0.0.40
codegen_flags: <defaults>
</compile_context>

<pallas_src>
import math

import jax
import jax.numpy as jnp
from jax.experimental import pallas as pl
from jax.experimental.pallas import tpu as pltpu


NEG_SLOPE = 0.2  # GATv2Conv default negative_slope


# ---------------------------------------------------------------------------
# Kernel 1: shared linear transform  g_ext = x @ W_ext + b_ext
# ---------------------------------------------------------------------------
def _linear_kernel(x_ref, w_ref, b_ref, o_ref):
    x = x_ref[...].astype(jnp.bfloat16)
    y = jnp.dot(x, w_ref[...], preferred_element_type=jnp.float32) + b_ref[...]
    o_ref[...] = y.astype(o_ref.dtype)


def linear(x, w_bf16, b, *, block_rows=256):
    n, fin = x.shape
    fout = w_bf16.shape[1]
    return pl.pallas_call(
        _linear_kernel,
        out_shape=jax.ShapeDtypeStruct((n, fout), jnp.bfloat16),
        grid_spec=pltpu.PrefetchScalarGridSpec(
            num_scalar_prefetch=0,
            grid=(n // block_rows,),
            in_specs=[
                pl.BlockSpec((block_rows, fin), lambda i: (i, 0)),
                pl.BlockSpec((fin, fout), lambda i: (0, 0)),
                pl.BlockSpec((1, fout), lambda i: (0, 0)),
            ],
            out_specs=pl.BlockSpec((block_rows, fout), lambda i: (i, 0)),
        ),
        compiler_params=pltpu.CompilerParams(dimension_semantics=("parallel",)),
    )(x, w_bf16, b)


# ---------------------------------------------------------------------------
# Kernel 2: GATv2 attention + masked online softmax + aggregation
# ---------------------------------------------------------------------------
def make_gatv2_attn_kernel(heads, out_ch, concat, apply_relu, apply_log_softmax,
                           compute_dtype):
    H, C = heads, out_ch
    HC = H * C
    cdt = compute_dtype  # bf16 on v6e/v7x (native bf16 VPU), f32 elsewhere

    def kernel(att_ref,      # SMEM [H, C]        (1-slope)*att
               g_ref,        # VMEM [N, HC+H]     node features + r columns (bf16, resident)
               gT_ref,       # VMEM [HC+H, tJ]    source-node features, transposed tile
               adj_ref,      # VMEM [tI, tJ]      int8 mask, adj[i,j]=1 iff edge j->i
               bias_ref,     # VMEM [1, out_dim]
               out_ref,      # VMEM [tI, out_dim]
               m_scr, l_scr, acc_scr):
        j = pl.program_id(1)
        block_i = adj_ref.shape[0]
        block_j = adj_ref.shape[1]

        @pl.when(j == 0)
        def _init():
            m_scr[...] = jnp.full_like(m_scr, -1e30)
            l_scr[...] = jnp.zeros_like(l_scr)
            acc_scr[...] = jnp.zeros_like(acc_scr)

        row0 = pl.multiple_of(pl.program_id(0) * block_i, block_i)
        col0 = pl.multiple_of(j * block_j, block_j)

        # mask bias: 0 on edges, -1e30 off-edges (f32, computed once per tile; the
        # -1e30 is exact under f32 addition of finite logits, so no second mask
        # multiply is needed inside the head loop)
        neg_bias = (adj_ref[...].astype(jnp.float32) - 1.0) * 1e30      # [tI, tJ]

        gi = g_ref[pl.ds(row0, block_i), :].astype(cdt)     # [tI, HC+H] targets
        gj = g_ref[pl.ds(col0, block_j), :]                 # [tJ, HC+H] sources (bf16, MXU)
        gT = gT_ref[...].astype(cdt)                        # [HC+H, tJ] sources^T (logits)

        for h in range(H):                                  # static head unroll
            # rank-1 linear part of the split leaky_relu: slope*(r_i + r_j),
            # r precomputed per node as the last H fused columns of g_ext.
            e = gi[:, HC + h:HC + h + 1] + gT[HC + h:HC + h + 1, :]      # [tI, tJ]
            for c in range(C):                              # hot VPU loop: add/max/fma
                idx = h * C + c
                s = gi[:, idx:idx + 1] + gT[idx:idx + 1, :]
                s = jnp.maximum(s, 0.0)                      # relu part only
                e = e + att_ref[h, c].astype(cdt) * s        # att pre-scaled by (1-slope)

            # ---- online (flash-style) masked softmax over source blocks (f32) ----
            ef = e.astype(jnp.float32) + neg_bias
            m_prev = m_scr[:, h:h + 1]
            m_new = jnp.maximum(m_prev, jnp.max(ef, axis=1, keepdims=True))
            scale = jnp.exp(m_prev - m_new)
            p = jnp.exp(ef - m_new)
            l_scr[:, h:h + 1] = scale * l_scr[:, h:h + 1] + jnp.sum(p, axis=1, keepdims=True)
            acc_scr[:, h * C:(h + 1) * C] = (
                scale * acc_scr[:, h * C:(h + 1) * C]
                + jnp.dot(p.astype(jnp.bfloat16), gj[:, h * C:(h + 1) * C],
                          preferred_element_type=jnp.float32))
            m_scr[:, h:h + 1] = m_new

        @pl.when(j == pl.num_programs(1) - 1)
        def _finalize():
            outs = []
            for h in range(H):
                # nodes with zero in-edges keep m == -1e30 -> output 0 (PyG semantics)
                seen = m_scr[:, h:h + 1] > -1e29
                inv = pl.reciprocal(jnp.maximum(l_scr[:, h:h + 1], 1e-16), approx=True)
                outs.append(jnp.where(seen, acc_scr[:, h * C:(h + 1) * C] * inv, 0.0))
            if concat:
                o = jnp.concatenate(outs, axis=-1) + bias_ref[...]
            else:
                o = outs[0]
                for t in outs[1:]:
                    o = o + t
                o = o * (1.0 / H) + bias_ref[...]            # mean over heads
            if apply_relu:
                o = jnp.maximum(o, 0.0)
            if apply_log_softmax:
                z = o - jnp.max(o, axis=-1, keepdims=True)
                o = z - jnp.log(jnp.sum(jnp.exp(z), axis=-1, keepdims=True))
            out_ref[...] = o.astype(out_ref.dtype)           # single lane-dense store

    return kernel


def gatv2_conv(g, gT, adj, att_relu, bias, *, heads, out_ch, concat, relu, log_softmax,
               block_i=256, block_j=512, compute_dtype=jnp.float32):
    n, hcH = g.shape                                  # hcH = heads*out_ch + heads
    out_dim = heads * out_ch if concat else out_ch
    kernel = make_gatv2_attn_kernel(heads, out_ch, concat, relu, log_softmax,
                                    compute_dtype)
    # TODO(synk): g is kept fully VMEM-resident (fine for n_pad*hcH*2B << VMEM); for
    # very large graphs tile g by j and/or switch to a CSR neighbor-gather kernel.
    return pl.pallas_call(
        kernel,
        out_shape=jax.ShapeDtypeStruct((n, out_dim), jnp.float32),
        grid_spec=pltpu.PrefetchScalarGridSpec(
            num_scalar_prefetch=0,
            grid=(n // block_i, n // block_j),
            in_specs=[
                pl.BlockSpec(memory_space=pltpu.MemorySpace.SMEM),        # att_relu [H, C]
                pl.BlockSpec((n, hcH), lambda i, j: (0, 0)),              # g (VMEM-resident)
                pl.BlockSpec((hcH, block_j), lambda i, j: (0, j)),        # g^T source tile
                pl.BlockSpec((block_i, block_j), lambda i, j: (i, j)),    # adj tile (int8)
                pl.BlockSpec((1, out_dim), lambda i, j: (0, 0)),          # bias
            ],
            out_specs=pl.BlockSpec((block_i, out_dim), lambda i, j: (i, 0)),
            scratch_shapes=[
                pltpu.VMEM((block_i, heads), jnp.float32),            # running max
                pltpu.VMEM((block_i, heads), jnp.float32),            # running denom
                pltpu.VMEM((block_i, heads * out_ch), jnp.float32),   # running numerator
            ],
        ),
        compiler_params=pltpu.CompilerParams(
            dimension_semantics=("parallel", "arbitrary"),
            vmem_limit_bytes=32 * 1024 * 1024,
        ),
    )(att_relu, g, gT, adj, bias)


# ---------------------------------------------------------------------------
# Parameter construction (deterministic, mirrors GATv2.__init__ layer stacking)
# ---------------------------------------------------------------------------
def _glorot(key, shape):
    fan_in, fan_out = shape
    limit = (6.0 / (fan_in + fan_out)) ** 0.5
    return jax.random.uniform(key, shape, jnp.float32, -limit, limit)


def init_params(key, in_channels, hidden_channels, out_channels, heads, num_layers):
    specs = []
    for i in range(num_layers):
        if i == 0:
            specs.append((in_channels, hidden_channels, True))
        specs.append((hidden_channels * heads, hidden_channels, True))
        if i == num_layers - 1:
            specs.append((hidden_channels * heads, out_channels, False))
    params = []
    for fin, cout, concat in specs:
        key, k1, k2 = jax.random.split(key, 3)
        hc = heads * cout
        w = _glorot(k1, (fin, hc))                         # lin_l weight (transposed)
        bl = jnp.zeros((1, hc), jnp.float32)               # lin_l bias
        att = _glorot(k2, (heads, cout))                   # attention vector
        # A[h*C+c, h] = att[h, c]  ->  r = slope * (g @ A), fused into extra W columns
        A = jnp.zeros((hc, heads), jnp.float32)
        for h in range(heads):
            A = A.at[h * cout:(h + 1) * cout, h].set(att[h])
        params.append(dict(
            w_ext=jnp.concatenate([w, NEG_SLOPE * (w @ A)], axis=1),
            b_ext=jnp.concatenate([bl, NEG_SLOPE * (bl @ A)], axis=1),
            att_relu=(1.0 - NEG_SLOPE) * att,              # (1-slope)*att, folded host-side
            bias=jnp.zeros((1, hc if concat else cout), jnp.float32),
            out_ch=cout,
            concat=concat,
        ))
    return params


def _logit_compute_dtype():
    # bf16 VPU math for the logit loop on v6e / v7x (native packed-bf16 VALU);
    # f32 everywhere else (v5e has no bf16 VPU).
    try:
        kind = jax.devices()[0].device_kind.lower()
    except Exception:
        return jnp.float32
    if ("v6" in kind) or ("v7" in kind) or ("7x" in kind):
        return jnp.bfloat16
    return jnp.float32


# ---------------------------------------------------------------------------
# Full GATv2 forward (dropout is identity at p=0 / eval)
# ---------------------------------------------------------------------------
def gatv2_forward(x, edge_index, params, *, heads, block_i=256, block_j=512):
    n = x.shape[0]
    pad = math.lcm(block_i, block_j)
    n_pad = ((n + pad - 1) // pad) * pad

    # dense int8 0/1 adjacency: adj[target, source] = 1 iff edge source->target.
    # Padded nodes have no edges; their rows are sliced off at the end.
    # TODO(synk): bit-pack adj (uint32) + in-kernel unpack for very large graphs.
    adj = jnp.zeros((n_pad, n_pad), jnp.int8).at[edge_index[1], edge_index[0]].set(1)

    h = jnp.zeros((n_pad, x.shape[1]), jnp.float32).at[:n, :].set(x)
    cdt = _logit_compute_dtype()

    num = len(params)
    for i, p in enumerate(params):
        last = (i == num - 1)
        g = linear(h, p["w_ext"].astype(jnp.bfloat16), p["b_ext"], block_rows=block_i)
        gT = jnp.transpose(g)     # tiny [n_pad, hc+H] bf16 -> lane-dense source axis
        h = gatv2_conv(g, gT, adj, p["att_relu"], p["bias"],
                       heads=heads, out_ch=p["out_ch"], concat=p["concat"],
                       relu=not last, log_softmax=last,
                       block_i=block_i, block_j=block_j, compute_dtype=cdt)
    return h[:n]


# TODO(synk): GATv2.inference() (neighbor-sampled subgraph loader loop) is host-side
# data plumbing with no clean dense-kernel equivalent and is not implemented here.

if __name__ == "__main__":
    key = jax.random.PRNGKey(0)
    kx, kp = jax.random.split(key, 2)

    N = 16            # nodes
    in_channels = 16
    hidden = 8
    heads = 2
    out_classes = 4
    num_layers = 1    # -> 3 GATv2Conv layers (concat, concat, mean) per the module

    x = jax.random.normal(kx, (N, in_channels), jnp.float32)

    # bidirectional ring + skip edges so every node has incoming edges
    idx = jnp.arange(N)
    src = jnp.concatenate([idx, (idx + 1) % N, idx])
    dst = jnp.concatenate([(idx + 1) % N, idx, (idx + 3) % N])
    edge_index = jnp.stack([src, dst]).astype(jnp.int32)   # [2, E]

    params = init_params(kp, in_channels, hidden, out_classes, heads, num_layers)

    out = gatv2_forward(x, edge_index, params, heads=heads)
    out = jax.block_until_ready(out)

    assert out.shape == (N, out_classes), out.shape
    assert bool(jnp.all(jnp.isfinite(out)))
    # rows of log_softmax must sum (in prob space) to 1
    assert bool(jnp.allclose(jnp.sum(jnp.exp(out), axis=-1), 1.0, atol=1e-4))
    print("KERNEL_OK")
</pallas_src>

<mosaic_0001>
module attributes {stable_mosaic.version = 11 : i64} {
  func.func @_linear_kernel(%arg0: i32, %arg1: memref<256x16xf32, #tpu.memory_space<vmem>>, %arg2: memref<16x18xbf16, #tpu.memory_space<vmem>>, %arg3: memref<1x18xf32, #tpu.memory_space<vmem>>, %arg4: memref<256x18xbf16, #tpu.memory_space<vmem>>) attributes {dimension_semantics = [#tpu.dimension_semantics<parallel>], iteration_bounds = array<i64: 2>, scalar_prefetch = 0 : i64, scratch_operands = 0 : i64, tpu.core_type = #tpu.core_type<tc>, window_params = [{transform_indices = @transform_0, window_bounds = array<i64: 256, 16>}, {pipeline_mode = #tpu.pipeline_mode<synchronous>, transform_indices = @transform_1, window_bounds = array<i64: 16, 18>}, {pipeline_mode = #tpu.pipeline_mode<synchronous>, transform_indices = @transform_2, window_bounds = array<i64: 1, 18>}, {transform_indices = @transform_3, window_bounds = array<i64: 256, 18>}]} {
    %c0 = arith.constant 0 : index
    %c0_0 = arith.constant 0 : index
    %0 = vector.load %arg1[%c0, %c0_0] : memref<256x16xf32, #tpu.memory_space<vmem>>, vector<256x16xf32>
    %1 = arith.truncf %0 : vector<256x16xf32> to vector<256x16xbf16>
    %c0_1 = arith.constant 0 : index
    %c0_2 = arith.constant 0 : index
    %2 = vector.load %arg2[%c0_1, %c0_2] : memref<16x18xbf16, #tpu.memory_space<vmem>>, vector<16x18xbf16>
    %cst = arith.constant dense<0.000000e+00> : vector<256x18xf32>
    %3 = tpu.matmul %1, %2, %cst {dimension_numbers = #tpu.dot_dimension_numbers<[1], [0], [0], [1], [0, 0, 1, 1], [], []>} : vector<256x16xbf16>, vector<16x18xbf16>, vector<256x18xf32> -> vector<256x18xf32>
    %c0_3 = arith.constant 0 : index
    %c0_4 = arith.constant 0 : index
    %4 = vector.load %arg3[%c0_3, %c0_4] : memref<1x18xf32, #tpu.memory_space<vmem>>, vector<1x18xf32>
    %5 = vector.broadcast %4 : vector<1x18xf32> to vector<256x18xf32>
    %6 = arith.addf %3, %5 : vector<256x18xf32>
    %7 = arith.truncf %6 : vector<256x18xf32> to vector<256x18xbf16>
    %c0_5 = arith.constant 0 : index
    %c0_6 = arith.constant 0 : index
    %8 = vector.load %arg4[%c0_5, %c0_6] : memref<256x18xbf16, #tpu.memory_space<vmem>>, vector<256x18xbf16>
    tpu.vector_store %arg4[%c0_5, %c0_6], %7 {strides = array<i32>} : memref<256x18xbf16, #tpu.memory_space<vmem>>, vector<256x18xbf16>,
    return
  }
  func.func @transform_0(%arg0: i32) -> (i32, i32) {
    %c0_i32 = arith.constant 0 : i32
    %c0_i32_0 = arith.constant 0 : i32
    return %arg0, %c0_i32 : i32, i32
  }
  func.func @transform_1(%arg0: i32) -> (i32, i32) {
    %c0_i32 = arith.constant 0 : i32
    %c0_i32_0 = arith.constant 0 : i32
    %c0_i32_1 = arith.constant 0 : i32
    return %c0_i32, %c0_i32_0 : i32, i32
  }
  func.func @transform_2(%arg0: i32) -> (i32, i32) {
    %c0_i32 = arith.constant 0 : i32
    %c0_i32_0 = arith.constant 0 : i32
    %c0_i32_1 = arith.constant 0 : i32
    return %c0_i32, %c0_i32_0 : i32, i32
  }
  func.func @transform_3(%arg0: i32) -> (i32, i32) {
    %c0_i32 = arith.constant 0 : i32
    %c0_i32_0 = arith.constant 0 : i32
    return %arg0, %c0_i32 : i32, i32
  }
}

</mosaic_0001>

<bundles_post_ra>
// kernel: tpu_custom_call.1
= control target key start
LH: loop header
LB: loop body
LE: loop exit
PB: predicated region body
PF: predicated region fallthrough
CT: control target
= control target key end

     0   :  { %s848_s12 = smov 0   ;;  %s1025_s0 = inlined_call_operand.vmem [shape: f32[512,16], index: 0, kind: input, shape index: {}]   ;;  %s1026_s1 = inlined_call_operand.vmem [shape: bf16[16,18], index: 1, kind: input, shape index: {}]   ;;  %s1027_s2 = inlined_call_operand.vmem [shape: f32[1,18], index: 2, kind: input, shape index: {}]   ;;  %s1028_s3 = inlined_call_operand.vmem [shape: bf16[512,18], index: 3, kind: output, shape index: {}]  }
   0x1 LB: > { %s665_s13 = sadd.s32 4294967295, %s826_s12   ;;  %p669_p0 = scmp.ge.s32.totalorder %s826_s12, 1  ;;  %s826_s12 = sphi %s848_s12, %s13_s12  }
   0x2   : > { %p138_p1 = scmp.lt.s32.totalorder %s826_s12, 3 }
   0x4   : > { %p139_p2 = pnand %p669_p0, %p138_p1 }
   0x5   : > { %v819_v0 = vld [vmem:[%s1026_s1] sm:$0xff] (!%p139_p2)   ;;  %s670_s16 = sshll.u32 (!%p139_p2), %s665_s13, 5  ;;  %vm238_vm0 = vcmask (!%p139_p2), 130048   ;;  %vm576_vm1 = vcmask (!%p139_p2), 142336  }
   0x6   : > { %142 = sbr.rel (%p139_p2) target bundleno = 265 (0x109), region = 32  ;;  %p163_p3 = scmp.lt.s32.totalorder (!%p139_p2), %s670_s16, 63  ;;  %775 = vmatprep.subr.bf16.mxu0 (!%p139_p2), %v819_v0  ;;  %809 = vmatprep.subr.bf16.mxu1 (!%p139_p2), %v819_v0  ;;  %v918_v49 = vld [vmem:[%s1027_s2] ss:$0 sm:$0xff] (!%p139_p2) }
   0x7   : > { %776 = vmatpush3.bf16.msra.mxu0 (!%p139_p2), %v819_v0  ;;  %810 = vmatpush3.bf16.msra.mxu1 (!%p139_p2), %v819_v0 }
   0xd   : > { %s1030_s16 = smov (!%p163_p3, %s670_s16), 63 }
   0xe   : > { %s671_s17 = sshll.u32 %s1030_s16, 3  ;;  %s673_s23 = sshll.u32 %s1030_s16, 2 }
   0xf   : > { %s865_s20 = scalar_lea.vmem %s1025_s0, %s671_s17  ;;  %s925_s26 = scalar_lea.vmem %s1028_s3, %s673_s23 }
  0x10   : > { %v175_v1 = vld [vmem:[%s865_s20] sm:$0xff]  ;;  %v176_v2 = vld [vmem:[%s865_s20 + $0x8] sm:$0xff]  ;;  %v177_v6 = vld [vmem:[%s865_s20 + $0x10] sm:$0xff] }
  0x11   : > { %v191_v3 = vld [vmem:[%s865_s20 + $0x80] sm:$0xff]  ;;  %v207_v4 = vpack.c.bf16 %v176_v2, %v175_v1  ;;  %v192_v5 = vld [vmem:[%s865_s20 + $0x88] sm:$0xff]  ;;  %v178_v7 = vld [vmem:[%s865_s20 + $0x18] sm:$0xff] }
  0x12   : > { %v215_v8 = vpack.c.bf16 %v192_v5, %v191_v3  ;;  %v208_v9 = vpack.c.bf16 %v178_v7, %v177_v6  ;;  %v193_v10 = vld [vmem:[%s865_s20 + $0x90] sm:$0xff]  ;;  %v194_v11 = vld [vmem:[%s865_s20 + $0x98] sm:$0xff]  ;;  %v179_v12 = vld [vmem:[%s865_s20 + $0x20] sm:$0xff] }
  0x13   : > { %777 = vmatprep.mubr.msk.bf16.mxu0 %vm238_vm0, %v207_v4  ;;  %v216_v13 = vpack.c.bf16 %v194_v11, %v193_v10  ;;  %v180_v14 = vld [vmem:[%s865_s20 + $0x28] sm:$0xff]  ;;  %v195_v15 = vld [vmem:[%s865_s20 + $0xa0] sm:$0xff]  ;;  %v181_v19 = vld [vmem:[%s865_s20 + $0x30] sm:$0xff] }
  0x14   : > { %v196_v16 = vld [vmem:[%s865_s20 + $0xa8] sm:$0xff]  ;;  %793 = vmatprep.mubr.msk.bf16.mxu1 %vm238_vm0, %v215_v8  ;;  %778 = vmatmul.mubr.msk.bf16.vlgmr.msra.gmra.mrb[0].mxu0 %vm238_vm0, %v208_v9  ;;  %v209_v17 = vpack.c.bf16 %v180_v14, %v179_v12  ;;  %v182_v20 = vld [vmem:[%s865_s20 + $0x38] sm:$0xff]  ;;  %v197_v21 = vld [vmem:[%s865_s20 + $0xb0] sm:$0xff] }
  0x15   : > { %v217_v18 = vpack.c.bf16 %v196_v16, %v195_v15  ;;  %794 = vmatmul.mubr.msk.bf16.vlgmr.msra.gmra.mrb[0].mxu1 %vm238_vm0, %v216_v13  ;;  %v198_v22 = vld [vmem:[%s865_s20 + $0xb8] sm:$0xff]  ;;  %v183_v23 = vld [vmem:[%s865_s20 + $0x40] sm:$0xff]  ;;  %v184_v24 = vld [vmem:[%s865_s20 + $0x48] sm:$0xff]  ;;  %v210_v27 = vpack.c.bf16 %v182_v20, %v181_v19 }
  0x16   : > { %781 = vmatprep.mubr.msk.bf16.mxu0 %vm238_vm0, %v209_v17  ;;  %v199_v25 = vld [vmem:[%s865_s20 + $0xc0] sm:$0xff]  ;;  %v200_v26 = vld [vmem:[%s865_s20 + $0xc8] sm:$0xff]  ;;  %v218_v28 = vpack.c.bf16 %v198_v22, %v197_v21  ;;  %v211_v29 = vpack.c.bf16 %v184_v24, %v183_v23  ;;  %v185_v31 = vld [vmem:[%s865_s20 + $0x50] sm:$0xff] }
  0x17   : > { %797 = vmatprep.mubr.msk.bf16.mxu1 %vm238_vm0, %v217_v18  ;;  %v219_v30 = vpack.c.bf16 %v200_v26, %v199_v25  ;;  %v186_v32 = vld [vmem:[%s865_s20 + $0x58] sm:$0xff]  ;;  %v201_v33 = vld [vmem:[%s865_s20 + $0xd0] sm:$0xff]  ;;  %v187_v35 = vld [vmem:[%s865_s20 + $0x60] sm:$0xff] }
  0x18   : > { %v202_v34 = vld [vmem:[%s865_s20 + $0xd8] sm:$0xff]  ;;  %v188_v36 = vld [vmem:[%s865_s20 + $0x68] sm:$0xff]  ;;  %v203_v37 = vld [vmem:[%s865_s20 + $0xe0] sm:$0xff]  ;;  %v212_v39 = vpack.c.bf16 %v186_v32, %v185_v31 }
  0x19   : > { %v204_v38 = vld [vmem:[%s865_s20 + $0xe8] sm:$0xff]  ;;  %v220_v40 = vpack.c.bf16 %v202_v34, %v201_v33  ;;  %v213_v41 = vpack.c.bf16 %v188_v36, %v187_v35  ;;  %v189_v43 = vld [vmem:[%s865_s20 + $0x70] sm:$0xff]  ;;  %v190_v44 = vld [vmem:[%s865_s20 + $0x78] sm:$0xff] }
  0x1a   : > { %v221_v42 = vpack.c.bf16 %v204_v38, %v203_v37  ;;  %v205_v45 = vld [vmem:[%s865_s20 + $0xf0] sm:$0xff]  ;;  %v206_v46 = vld [vmem:[%s865_s20 + $0xf8] sm:$0xff]  ;;  %v214_v47 = vpack.c.bf16 %v190_v44, %v189_v43 }
  0x1b   : > { %v222_v48 = vpack.c.bf16 %v206_v46, %v205_v45 }
  0x1c   : > { %782 = vmatmul.mubr.msk.bf16.gmra.mrb[4].mxu0 %vm238_vm0, %v210_v27 }
  0x1d   : > { %798 = vmatmul.mubr.msk.bf16.gmra.mrb[4].mxu1 %vm238_vm0, %v218_v28  ;;  %785 = vmatprep.mubr.msk.bf16.mxu0 %vm238_vm0, %v211_v29 }
  0x1e   : > { %801 = vmatprep.mubr.msk.bf16.mxu1 %vm238_vm0, %v219_v30 }
  0x24   : > { %786 = vmatmul.mubr.msk.bf16.gmra.mrb[8].mxu0 %vm238_vm0, %v212_v39 }
  0x25   : > { %802 = vmatmul.mubr.msk.bf16.gmra.mrb[8].mxu1 %vm238_vm0, %v220_v40  ;;  %789 = vmatprep.mubr.msk.bf16.mxu0 %vm238_vm0, %v213_v41 }
  0x26   : > { %805 = vmatprep.mubr.msk.bf16.mxu1 %vm238_vm0, %v221_v42 }
  0x2c   : > { %790 = vmatmul.mubr.msk.bf16.gmra.mrb[12].mxu0 %vm238_vm0, %v214_v47 }
  0x2d   : > { %806 = vmatmul.mubr.msk.bf16.gmra.mrb[12].mxu1 %vm238_vm0, %v222_v48 }
  0xe7   : > { %v779_v50 = vpop.f32.mrb[0].mxu0 }
  0xe8   : > { %v330_v51 = vadd.f32 %v779_v50, %v918_v49  ;;  %v795_v52 = vpop.f32.mrb[0].mxu1  ;;  %v321_v53 = vpop.f32.mrb[1].mxu0 }
  0xe9   : > { %v394_v54 = vadd.f32 %v795_v52, %v918_v49  ;;  %v322_v55 = vadd.f32 %v918_v49, %v321_v53  ;;  %v385_v56 = vpop.f32.mrb[1].mxu1  ;;  %v780_v57 = vpop.f32.mrb[2].mxu0 }
  0xea   : > { %v728_v58 = vpack.c.bf16 %v330_v51, %v330_v51  ;;  %v386_v59 = vadd.f32 %v918_v49, %v385_v56  ;;  %v333_v60 = vadd.f32 %v780_v57, %v918_v49  ;;  %v796_v61 = vpop.f32.mrb[2].mxu1  ;;  %v324_v62 = vpop.f32.mrb[3].mxu0 }
  0xeb   : > { %v744_v63 = vpack.c.bf16 %v394_v54, %v394_v54  ;;  %v726_v0 = vpack.c.bf16 %v322_v55, %v322_v55  ;;  %v397_v1 = vadd.f32 %v796_v61, %v918_v49  ;;  %v325_v2 = vadd.f32 %v918_v49, %v324_v62  ;;  %v388_v3 = vpop.f32.mrb[3].mxu1 }
  0xec   : > { %579 = vst.msk [vmem:[%s925_s26 + $0x8] sm:$0xf] %vm576_vm1, %v728_v58  ;;  %v742_v4 = vpack.c.bf16 %v386_v59, %v386_v59  ;;  %v729_v5 = vpack.c.bf16 %v333_v60, %v333_v60  ;;  %v389_v6 = vadd.f32 %v918_v49, %v388_v3 }
  0xed   : > { %595 = vst.msk [vmem:[%s925_s26 + $0x48] sm:$0xf] %vm576_vm1, %v744_v63  ;;  %577 = vst.msk [vmem:[%s925_s26] sm:$0xf] %vm576_vm1, %v726_v0  ;;  %v745_v7 = vpack.c.bf16 %v397_v1, %v397_v1  ;;  %v727_v8 = vpack.c.bf16 %v325_v2, %v325_v2 }
  0xee   : > { %593 = vst.msk [vmem:[%s925_s26 + $0x40] sm:$0xf] %vm576_vm1, %v742_v4  ;;  %580 = vst.msk [vmem:[%s925_s26 + $0xc] sm:$0xf] %vm576_vm1, %v729_v5  ;;  %v743_v9 = vpack.c.bf16 %v389_v6, %v389_v6 }
  0xef   : > { %596 = vst.msk [vmem:[%s925_s26 + $0x4c] sm:$0xf] %vm576_vm1, %v745_v7  ;;  %578 = vst.msk [vmem:[%s925_s26 + $0x4] sm:$0xf] %vm576_vm1, %v727_v8  ;;  %v783_v10 = vpop.f32.mrb[4].mxu0 }
  0xf0   : > { %594 = vst.msk [vmem:[%s925_s26 + $0x44] sm:$0xf] %vm576_vm1, %v743_v9  ;;  %v346_v11 = vadd.f32 %v783_v10, %v918_v49  ;;  %v799_v12 = vpop.f32.mrb[4].mxu1  ;;  %v337_v13 = vpop.f32.mrb[5].mxu0 }
  0xf1   : > { %v410_v14 = vadd.f32 %v799_v12, %v918_v49  ;;  %v338_v15 = vadd.f32 %v918_v49, %v337_v13  ;;  %v401_v16 = vpop.f32.mrb[5].mxu1  ;;  %v784_v17 = vpop.f32.mrb[6].mxu0 }
  0xf2   : > { %v732_v18 = vpack.c.bf16 %v346_v11, %v346_v11  ;;  %v402_v19 = vadd.f32 %v918_v49, %v401_v16  ;;  %v349_v20 = vadd.f32 %v784_v17, %v918_v49  ;;  %v800_v21 = vpop.f32.mrb[6].mxu1  ;;  %v340_v22 = vpop.f32.mrb[7].mxu0 }
  0xf3   : > { %v748_v23 = vpack.c.bf16 %v410_v14, %v410_v14  ;;  %v730_v24 = vpack.c.bf16 %v338_v15, %v338_v15  ;;  %v413_v25 = vadd.f32 %v800_v21, %v918_v49  ;;  %v341_v26 = vadd.f32 %v918_v49, %v340_v22  ;;  %v404_v27 = vpop.f32.mrb[7].mxu1 }
  0xf4   : > { %583 = vst.msk [vmem:[%s925_s26 + $0x18] sm:$0xf] %vm576_vm1, %v732_v18  ;;  %v746_v28 = vpack.c.bf16 %v402_v19, %v402_v19  ;;  %v733_v29 = vpack.c.bf16 %v349_v20, %v349_v20  ;;  %v405_v30 = vadd.f32 %v918_v49, %v404_v27 }
  0xf5   : > { %599 = vst.msk [vmem:[%s925_s26 + $0x58] sm:$0xf] %vm576_vm1, %v748_v23  ;;  %581 = vst.msk [vmem:[%s925_s26 + $0x10] sm:$0xf] %vm576_vm1, %v730_v24  ;;  %v749_v31 = vpack.c.bf16 %v413_v25, %v413_v25  ;;  %v731_v32 = vpack.c.bf16 %v341_v26, %v341_v26 }
  0xf6   : > { %597 = vst.msk [vmem:[%s925_s26 + $0x50] sm:$0xf] %vm576_vm1, %v746_v28  ;;  %584 = vst.msk [vmem:[%s925_s26 + $0x1c] sm:$0xf] %vm576_vm1, %v733_v29  ;;  %v747_v33 = vpack.c.bf16 %v405_v30, %v405_v30 }
  0xf7   : > { %600 = vst.msk [vmem:[%s925_s26 + $0x5c] sm:$0xf] %vm576_vm1, %v749_v31  ;;  %582 = vst.msk [vmem:[%s925_s26 + $0x14] sm:$0xf] %vm576_vm1, %v731_v32  ;;  %v787_v34 = vpop.f32.mrb[8].mxu0 }
  0xf8   : > { %598 = vst.msk [vmem:[%s925_s26 + $0x54] sm:$0xf] %vm576_vm1, %v747_v33  ;;  %v362_v35 = vadd.f32 %v787_v34, %v918_v49  ;;  %v803_v36 = vpop.f32.mrb[8].mxu1  ;;  %v353_v37 = vpop.f32.mrb[9].mxu0 }
  0xf9   : > { %v426_v38 = vadd.f32 %v803_v36, %v918_v49  ;;  %v354_v39 = vadd.f32 %v918_v49, %v353_v37  ;;  %v417_v40 = vpop.f32.mrb[9].mxu1  ;;  %v788_v41 = vpop.f32.mrb[10].mxu0 }
  0xfa   : > { %v736_v42 = vpack.c.bf16 %v362_v35, %v362_v35  ;;  %v418_v43 = vadd.f32 %v918_v49, %v417_v40  ;;  %v365_v44 = vadd.f32 %v788_v41, %v918_v49  ;;  %v804_v45 = vpop.f32.mrb[10].mxu1  ;;  %v356_v46 = vpop.f32.mrb[11].mxu0 }
  0xfb   : > { %v752_v47 = vpack.c.bf16 %v426_v38, %v426_v38  ;;  %v734_v48 = vpack.c.bf16 %v354_v39, %v354_v39  ;;  %v429_v50 = vadd.f32 %v804_v45, %v918_v49  ;;  %v357_v51 = vadd.f32 %v918_v49, %v356_v46  ;;  %v420_v52 = vpop.f32.mrb[11].mxu1 }
  0xfc   : > { %587 = vst.msk [vmem:[%s925_s26 + $0x28] sm:$0xf] %vm576_vm1, %v736_v42  ;;  %v750_v53 = vpack.c.bf16 %v418_v43, %v418_v43  ;;  %v737_v54 = vpack.c.bf16 %v365_v44, %v365_v44  ;;  %v421_v55 = vadd.f32 %v918_v49, %v420_v52 }
  0xfd   : > { %603 = vst.msk [vmem:[%s925_s26 + $0x68] sm:$0xf] %vm576_vm1, %v752_v47  ;;  %585 = vst.msk [vmem:[%s925_s26 + $0x20] sm:$0xf] %vm576_vm1, %v734_v48  ;;  %v753_v56 = vpack.c.bf16 %v429_v50, %v429_v50  ;;  %v735_v57 = vpack.c.bf16 %v357_v51, %v357_v51 }
  0xfe   : > { %601 = vst.msk [vmem:[%s925_s26 + $0x60] sm:$0xf] %vm576_vm1, %v750_v53  ;;  %588 = vst.msk [vmem:[%s925_s26 + $0x2c] sm:$0xf] %vm576_vm1, %v737_v54  ;;  %v751_v58 = vpack.c.bf16 %v421_v55, %v421_v55 }
  0xff   : > { %604 = vst.msk [vmem:[%s925_s26 + $0x6c] sm:$0xf] %vm576_vm1, %v753_v56  ;;  %586 = vst.msk [vmem:[%s925_s26 + $0x24] sm:$0xf] %vm576_vm1, %v735_v57  ;;  %v791_v59 = vpop.f32.mrb[12].mxu0 }
 0x100   : > { %602 = vst.msk [vmem:[%s925_s26 + $0x64] sm:$0xf] %vm576_vm1, %v751_v58  ;;  %v378_v60 = vadd.f32 %v791_v59, %v918_v49  ;;  %v807_v61 = vpop.f32.mrb[12].mxu1  ;;  %v369_v62 = vpop.f32.mrb[13].mxu0 }
 0x101   : > { %v442_v63 = vadd.f32 %v807_v61, %v918_v49  ;;  %v370_v0 = vadd.f32 %v918_v49, %v369_v62  ;;  %v433_v1 = vpop.f32.mrb[13].mxu1  ;;  %v792_v2 = vpop.f32.mrb[14].mxu0 }
 0x102   : > { %v740_v3 = vpack.c.bf16 %v378_v60, %v378_v60  ;;  %v434_v4 = vadd.f32 %v918_v49, %v433_v1  ;;  %v381_v5 = vadd.f32 %v792_v2, %v918_v49  ;;  %v808_v6 = vpop.f32.mrb[14].mxu1  ;;  %v372_v7 = vpop.f32.mrb[15].mxu0 }
 0x103   : > { %v756_v8 = vpack.c.bf16 %v442_v63, %v442_v63  ;;  %v738_v9 = vpack.c.bf16 %v370_v0, %v370_v0  ;;  %v445_v10 = vadd.f32 %v808_v6, %v918_v49  ;;  %v373_v11 = vadd.f32 %v918_v49, %v372_v7  ;;  %v436_v12 = vpop.f32.mrb[15].mxu1 }
 0x104   : > { %591 = vst.msk [vmem:[%s925_s26 + $0x38] sm:$0xf] %vm576_vm1, %v740_v3  ;;  %v754_v13 = vpack.c.bf16 %v434_v4, %v434_v4  ;;  %v741_v14 = vpack.c.bf16 %v381_v5, %v381_v5  ;;  %v437_v15 = vadd.f32 %v918_v49, %v436_v12 }
 0x105   : > { %607 = vst.msk [vmem:[%s925_s26 + $0x78] sm:$0xf] %vm576_vm1, %v756_v8  ;;  %589 = vst.msk [vmem:[%s925_s26 + $0x30] sm:$0xf] %vm576_vm1, %v738_v9  ;;  %v757_v16 = vpack.c.bf16 %v445_v10, %v445_v10  ;;  %v739_v17 = vpack.c.bf16 %v373_v11, %v373_v11 }
 0x106   : > { %605 = vst.msk [vmem:[%s925_s26 + $0x70] sm:$0xf] %vm576_vm1, %v754_v13  ;;  %592 = vst.msk [vmem:[%s925_s26 + $0x3c] sm:$0xf] %vm576_vm1, %v741_v14  ;;  %v755_v18 = vpack.c.bf16 %v437_v15, %v437_v15 }
 0x107   : > { %608 = vst.msk [vmem:[%s925_s26 + $0x7c] sm:$0xf] %vm576_vm1, %v757_v16  ;;  %590 = vst.msk [vmem:[%s925_s26 + $0x34] sm:$0xf] %vm576_vm1, %v739_v17 }
 0x108   : > { %606 = vst.msk [vmem:[%s925_s26 + $0x74] sm:$0xf] %vm576_vm1, %v755_v18 }
 0x109 PF: > { %s13_s12 = sadd.s32 1, %s826_s12  }
 0x10a   : > { %p10_p4 = scmp.ge.s32.totalorder %s13_s12, 4  }
 0x10c   :  { %12 = sbr.rel (!%p10_p4) target bundleno = 1 (0x1), region = 62 }

</bundles_post_ra>
